<compile_context>
chip_gen: v7x
topology: tpu7x:2x2x1
jax: 0.10.0
libtpu: 0.0.40
codegen_flags: <defaults>
</compile_context>

<pallas_src>
import functools

import jax
import jax.numpy as jnp
from jax.experimental import pallas as pl
from jax.experimental.pallas import tpu as pltpu


def _round_up(x, m):
    return ((x + m - 1) // m) * m


def _dualnet_fused_kernel(x_ref, w1_ref, b1_ref, w2_ref, b2_ref, o_ref, *, action_dim):
    # hidden = LeakyReLU(x @ W1 + b1)   (torch default negative_slope = 0.01)
    x = x_ref[...]
    w1 = w1_ref[...]
    h = jnp.dot(x.astype(w1.dtype), w1, preferred_element_type=jnp.float32)
    h = h + b1_ref[...]
    h = jnp.where(h >= 0.0, h, 0.01 * h)          # stays f32 (v5e-safe)

    # Fused heads: y[:, :A] = actor logits, y[:, A] = critic value, rest = 0.
    w2 = w2_ref[...]
    y = jnp.dot(h.astype(w2.dtype), w2, preferred_element_type=jnp.float32)
    y = y + b2_ref[...]

    # Softmax over the actor lanes only (lanes [0, action_dim)), exact division.
    lane = jax.lax.broadcasted_iota(jnp.int32, y.shape, dimension=1)
    actor_mask = lane < action_dim
    m = jnp.max(jnp.where(actor_mask, y, jnp.float32(-1e30)), axis=-1, keepdims=True)
    e = jnp.where(actor_mask, jnp.exp(y - m), 0.0)
    denom = jnp.sum(e, axis=-1, keepdims=True)
    probs = e / denom                              # exact normalization

    # Lane-dense (TILE_B, OUT_PAD) store: actor probs, critic raw value, zeros.
    o_ref[...] = jnp.where(actor_mask, probs, y).astype(o_ref.dtype)


def _fused_forward_slab(x, w1_p, b1_p, w2_p, b2_p, *, action_dim, tile_b):
    """x: (B, state_dim) f32 -> (B, OUT_PAD) f32 slab (actor probs | critic | 0)."""
    B, state_dim = x.shape
    out_pad = w2_p.shape[1]

    tb = min(tile_b, _round_up(B, 8))              # batch tile, multiple of 8
    b_pad = _round_up(B, tb)
    if b_pad != B:
        x = jnp.pad(x, ((0, b_pad - B), (0, 0)))   # inert zero rows, sliced off below

    kernel = functools.partial(_dualnet_fused_kernel, action_dim=action_dim)
    out = pl.pallas_call(
        kernel,
        out_shape=jax.ShapeDtypeStruct((b_pad, out_pad), jnp.float32),
        grid=(b_pad // tb,),
        in_specs=[
            pl.BlockSpec((tb, state_dim), lambda i: (i, 0)),   # batch-tiled x
            pl.BlockSpec(w1_p.shape, lambda i: (0, 0)),        # weights resident
            pl.BlockSpec(b1_p.shape, lambda i: (0, 0)),
            pl.BlockSpec(w2_p.shape, lambda i: (0, 0)),
            pl.BlockSpec(b2_p.shape, lambda i: (0, 0)),
        ],
        out_specs=pl.BlockSpec((tb, out_pad), lambda i: (i, 0)),
        compiler_params=pltpu.CompilerParams(
            dimension_semantics=("parallel",),                 # v7x: shard over TCs
        ),
    )(x, w1_p, b1_p, w2_p, b2_p)
    return out[:B]


class DualNetPallas:
    """JAX/Pallas re-implementation of the PyTorch DualNet forward pass."""

    def __init__(self, state_dim, action_dim, hidden_layer_dim=42, key=None,
                 matmul_dtype=jnp.float32, tile_b=128):
        if key is None:
            key = jax.random.PRNGKey(0)
        k1, k2, k3, k4, k5, k6 = jax.random.split(key, 6)

        def _linear_init(kw, kb, fan_in, fan_out):
            # torch.nn.Linear default: U(-1/sqrt(fan_in), 1/sqrt(fan_in))
            bound = 1.0 / jnp.sqrt(jnp.float32(fan_in))
            w = jax.random.uniform(kw, (fan_in, fan_out), jnp.float32, -bound, bound)
            b = jax.random.uniform(kb, (1, fan_out), jnp.float32, -bound, bound)
            return w, b

        # Unpadded "logical" parameters (kept for reference / inspection).
        self.w1, self.b1 = _linear_init(k1, k2, state_dim, hidden_layer_dim)
        self.wc, self.bc = _linear_init(k3, k4, hidden_layer_dim, 1)
        self.wa, self.ba = _linear_init(k5, k6, hidden_layer_dim, action_dim)

        self.state_dim = state_dim
        self.action_dim = action_dim
        self.hidden_dim = hidden_layer_dim

        # Padded, fused parameters (built once; zero padding is inert).
        h_pad = _round_up(max(hidden_layer_dim, 1), 128)
        out_pad = _round_up(action_dim + 1, 128)
        self._h_pad, self._out_pad = h_pad, out_pad

        w1_p = jnp.zeros((state_dim, h_pad), jnp.float32)
        w1_p = w1_p.at[:, :hidden_layer_dim].set(self.w1)
        b1_p = jnp.zeros((1, h_pad), jnp.float32)
        b1_p = b1_p.at[:, :hidden_layer_dim].set(self.b1)

        w2_p = jnp.zeros((h_pad, out_pad), jnp.float32)
        w2_p = w2_p.at[:hidden_layer_dim, :action_dim].set(self.wa)
        w2_p = w2_p.at[:hidden_layer_dim, action_dim].set(self.wc[:, 0])
        b2_p = jnp.zeros((1, out_pad), jnp.float32)
        b2_p = b2_p.at[:, :action_dim].set(self.ba)
        b2_p = b2_p.at[:, action_dim].set(self.bc[0, 0])

        # Only the MXU operands go to matmul_dtype; biases / accum stay f32.
        self.w1_p = w1_p.astype(matmul_dtype)
        self.w2_p = w2_p.astype(matmul_dtype)
        self.b1_p, self.b2_p = b1_p, b2_p

        # ---- jitted forward paths (built once; cached dispatch per shape) ----
        def _single(s, w1_pp, b1_pp, w2_pp, b2_pp):
            x = jnp.asarray(s, jnp.float32).reshape(1, -1)
            slab = _fused_forward_slab(x, w1_pp, b1_pp, w2_pp, b2_pp,
                                       action_dim=action_dim, tile_b=tile_b)
            return slab[0]                                   # (OUT_PAD,) single slab

        def _batch(xs, w1_pp, b1_pp, w2_pp, b2_pp):
            xs = jnp.asarray(xs, jnp.float32).reshape(xs.shape[0], -1)
            slab = _fused_forward_slab(xs, w1_pp, b1_pp, w2_pp, b2_pp,
                                       action_dim=action_dim, tile_b=tile_b)
            return slab[:, :action_dim], slab[:, action_dim]  # (B, A), (B,)

        self._single_fn = jax.jit(_single)
        self._batch_fn = jax.jit(_batch)

    # --- mirrors torch DualNet.forward(s, mode): per-state, returns squeezed ---
    def forward(self, s, mode):
        slab = self._single_fn(jnp.asarray(s, jnp.float32),
                               self.w1_p, self.b1_p, self.w2_p, self.b2_p)
        if mode == "actor":
            return slab[: self.action_dim]    # (action_dim,)
        return slab[self.action_dim]          # scalar ()

    __call__ = forward

    # --- batched throughput path (perf-review lever): B states, one launch ---
    def forward_batch(self, states, mode=None):
        actor, critic = self._batch_fn(states, self.w1_p, self.b1_p,
                                       self.w2_p, self.b2_p)
        if mode == "actor":
            return actor
        if mode == "critic":
            return critic
        return actor, critic


if __name__ == "__main__":
    state_dim, action_dim, hidden = 16, 8, 42

    key = jax.random.PRNGKey(0)
    net = DualNetPallas(state_dim, action_dim, hidden_layer_dim=hidden, key=key)

    # plain-JAX reference on the unpadded weights
    def ref_forward(x2d):
        h = x2d @ net.w1 + net.b1
        h = jnp.where(h >= 0, h, 0.01 * h)
        return jax.nn.softmax(h @ net.wa + net.ba, axis=-1), h @ net.wc + net.bc

    # ---- single-state forward (original torch semantics) ----
    s = jax.random.normal(jax.random.PRNGKey(1), (state_dim,), dtype=jnp.float32)
    actor_out = net(s, "actor")
    critic_out = net(s, "critic")
    jax.block_until_ready((actor_out, critic_out))

    ref_a, ref_c = ref_forward(s.reshape(1, -1))
    assert actor_out.shape == (action_dim,)
    assert critic_out.shape == ()
    assert jnp.allclose(actor_out, ref_a.squeeze(), atol=2e-3, rtol=2e-3), (actor_out, ref_a)
    assert jnp.allclose(jnp.sum(actor_out), 1.0, atol=1e-4)   # exact softmax normalization
    assert jnp.allclose(critic_out, ref_c.squeeze(), atol=2e-3, rtol=2e-3), (critic_out, ref_c)

    # ---- batched forward: B not a multiple of the tile, exercises padding+grid ----
    B = 200
    xs = jax.random.normal(jax.random.PRNGKey(2), (B, state_dim), dtype=jnp.float32)
    actor_b, critic_b = net.forward_batch(xs)
    jax.block_until_ready((actor_b, critic_b))

    ref_ab, ref_cb = ref_forward(xs)
    assert actor_b.shape == (B, action_dim)
    assert critic_b.shape == (B,)
    assert jnp.allclose(actor_b, ref_ab, atol=2e-3, rtol=2e-3)
    assert jnp.allclose(jnp.sum(actor_b, axis=-1), jnp.ones((B,)), atol=1e-4)
    assert jnp.allclose(critic_b, ref_cb.squeeze(-1), atol=2e-3, rtol=2e-3)

    # ---- bf16 matmul-operand variant (same weights; elementwise math stays f32) ----
    net_bf16 = DualNetPallas(state_dim, action_dim, hidden_layer_dim=hidden, key=key,
                             matmul_dtype=jnp.bfloat16)
    a16, c16 = net_bf16.forward_batch(xs)
    jax.block_until_ready((a16, c16))
    assert jnp.allclose(a16, ref_ab, atol=5e-2, rtol=5e-2)
    assert jnp.allclose(c16, ref_cb.squeeze(-1), atol=5e-2, rtol=5e-2)

    print("KERNEL_OK")
</pallas_src>

<mosaic_0001>
module attributes {stable_mosaic.version = 11 : i64} {
  func.func @_dualnet_fused_kernel(%arg0: i32, %arg1: memref<8x16xf32, #tpu.memory_space<vmem>>, %arg2: memref<16x128xf32, #tpu.memory_space<vmem>>, %arg3: memref<1x128xf32, #tpu.memory_space<vmem>>, %arg4: memref<128x128xf32, #tpu.memory_space<vmem>>, %arg5: memref<1x128xf32, #tpu.memory_space<vmem>>, %arg6: memref<8x128xf32, #tpu.memory_space<vmem>>) attributes {dimension_semantics = [#tpu.dimension_semantics<parallel>], iteration_bounds = array<i64: 1>, scalar_prefetch = 0 : i64, scratch_operands = 0 : i64, tpu.core_type = #tpu.core_type<tc>, window_params = [{transform_indices = @transform_0, window_bounds = array<i64: 8, 16>}, {pipeline_mode = #tpu.pipeline_mode<synchronous>, transform_indices = @transform_1, window_bounds = array<i64: 16, 128>}, {pipeline_mode = #tpu.pipeline_mode<synchronous>, transform_indices = @transform_2, window_bounds = array<i64: 1, 128>}, {pipeline_mode = #tpu.pipeline_mode<synchronous>, transform_indices = @transform_3, window_bounds = array<i64: 128, 128>}, {pipeline_mode = #tpu.pipeline_mode<synchronous>, transform_indices = @transform_4, window_bounds = array<i64: 1, 128>}, {transform_indices = @transform_5, window_bounds = array<i64: 8, 128>}]} {
    %c0 = arith.constant 0 : index
    %c0_0 = arith.constant 0 : index
    %0 = vector.load %arg1[%c0, %c0_0] : memref<8x16xf32, #tpu.memory_space<vmem>>, vector<8x16xf32>
    %c0_1 = arith.constant 0 : index
    %c0_2 = arith.constant 0 : index
    %1 = vector.load %arg2[%c0_1, %c0_2] : memref<16x128xf32, #tpu.memory_space<vmem>>, vector<16x128xf32>
    %cst = arith.constant dense<0.000000e+00> : vector<8x128xf32>
    %2 = tpu.matmul %0, %1, %cst {dimension_numbers = #tpu.dot_dimension_numbers<[1], [0], [0], [1], [0, 0, 1, 1], [], []>} : vector<8x16xf32>, vector<16x128xf32>, vector<8x128xf32> -> vector<8x128xf32>
    %c0_3 = arith.constant 0 : index
    %c0_4 = arith.constant 0 : index
    %3 = vector.load %arg3[%c0_3, %c0_4] : memref<1x128xf32, #tpu.memory_space<vmem>>, vector<1x128xf32>
    %4 = vector.broadcast %3 : vector<1x128xf32> to vector<8x128xf32>
    %5 = arith.addf %2, %4 : vector<8x128xf32>
    %cst_5 = arith.constant 0.000000e+00 : f32
    %6 = vector.broadcast %cst_5 : f32 to vector<8x128xf32>
    %7 = arith.cmpf oge, %5, %6 : vector<8x128xf32>
    %cst_6 = arith.constant 0.00999999977 : f32
    %8 = vector.broadcast %cst_6 : f32 to vector<8x128xf32>
    %9 = arith.mulf %8, %5 : vector<8x128xf32>
    %10 = arith.select %7, %5, %9 : vector<8x128xi1>, vector<8x128xf32>
    %c0_7 = arith.constant 0 : index
    %c0_8 = arith.constant 0 : index
    %11 = vector.load %arg4[%c0_7, %c0_8] : memref<128x128xf32, #tpu.memory_space<vmem>>, vector<128x128xf32>
    %cst_9 = arith.constant dense<0.000000e+00> : vector<8x128xf32>
    %12 = tpu.matmul %10, %11, %cst_9 {dimension_numbers = #tpu.dot_dimension_numbers<[1], [0], [0], [1], [0, 0, 1, 1], [], []>} : vector<8x128xf32>, vector<128x128xf32>, vector<8x128xf32> -> vector<8x128xf32>
    %c0_10 = arith.constant 0 : index
    %c0_11 = arith.constant 0 : index
    %13 = vector.load %arg5[%c0_10, %c0_11] : memref<1x128xf32, #tpu.memory_space<vmem>>, vector<1x128xf32>
    %14 = vector.broadcast %13 : vector<1x128xf32> to vector<8x128xf32>
    %15 = arith.addf %12, %14 : vector<8x128xf32>
    %16 = tpu.iota {dimensions = array<i32: 1>} : vector<8x128xi32>
    %c8_i32 = arith.constant 8 : i32
    %17 = vector.broadcast %c8_i32 : i32 to vector<8x128xi32>
    %18 = arith.cmpi slt, %16, %17 : vector<8x128xi32>
    %cst_12 = arith.constant -1.000000e+30 : f32
    %19 = vector.broadcast %cst_12 : f32 to vector<8x128xf32>
    %20 = arith.select %18, %15, %19 : vector<8x128xi1>, vector<8x128xf32>
    %cst_13 = arith.constant dense<0xFF800000> : vector<8xf32>
    %21 = vector.multi_reduction <maximumf>, %20, %cst_13 [1] : vector<8x128xf32> to vector<8xf32>
    %22 = vector.shape_cast %21 : vector<8xf32> to vector<8x1xf32>
    %23 = vector.broadcast %22 : vector<8x1xf32> to vector<8x128xf32>
    %24 = arith.subf %15, %23 : vector<8x128xf32>
    %25 = math.exp %24 : vector<8x128xf32>
    %cst_14 = arith.constant 0.000000e+00 : f32
    %26 = vector.broadcast %cst_14 : f32 to vector<8x128xf32>
    %27 = arith.select %18, %25, %26 : vector<8x128xi1>, vector<8x128xf32>
    %cst_15 = arith.constant dense<0.000000e+00> : vector<8xf32>
    %28 = vector.multi_reduction <add>, %27, %cst_15 [1] : vector<8x128xf32> to vector<8xf32>
    %29 = vector.shape_cast %28 : vector<8xf32> to vector<8x1xf32>
    %30 = vector.broadcast %29 : vector<8x1xf32> to vector<8x128xf32>
    %31 = arith.divf %27, %30 : vector<8x128xf32>
    %32 = arith.select %18, %31, %15 : vector<8x128xi1>, vector<8x128xf32>
    %c0_16 = arith.constant 0 : index
    %c0_17 = arith.constant 0 : index
    %33 = vector.load %arg6[%c0_16, %c0_17] : memref<8x128xf32, #tpu.memory_space<vmem>>, vector<8x128xf32>
    tpu.vector_store %arg6[%c0_16, %c0_17], %32 {strides = array<i32>} : memref<8x128xf32, #tpu.memory_space<vmem>>, vector<8x128xf32>,
    return
  }
  func.func @transform_0(%arg0: i32) -> (i32, i32) {
    %c0_i32 = arith.constant 0 : i32
    %c0_i32_0 = arith.constant 0 : i32
    return %arg0, %c0_i32 : i32, i32
  }
  func.func @transform_1(%arg0: i32) -> (i32, i32) {
    %c0_i32 = arith.constant 0 : i32
    %c0_i32_0 = arith.constant 0 : i32
    %c0_i32_1 = arith.constant 0 : i32
    return %c0_i32, %c0_i32_0 : i32, i32
  }
  func.func @transform_2(%arg0: i32) -> (i32, i32) {
    %c0_i32 = arith.constant 0 : i32
    %c0_i32_0 = arith.constant 0 : i32
    %c0_i32_1 = arith.constant 0 : i32
    return %c0_i32, %c0_i32_0 : i32, i32
  }
  func.func @transform_3(%arg0: i32) -> (i32, i32) {
    %c0_i32 = arith.constant 0 : i32
    %c0_i32_0 = arith.constant 0 : i32
    %c0_i32_1 = arith.constant 0 : i32
    return %c0_i32, %c0_i32_0 : i32, i32
  }
  func.func @transform_4(%arg0: i32) -> (i32, i32) {
    %c0_i32 = arith.constant 0 : i32
    %c0_i32_0 = arith.constant 0 : i32
    %c0_i32_1 = arith.constant 0 : i32
    return %c0_i32, %c0_i32_0 : i32, i32
  }
  func.func @transform_5(%arg0: i32) -> (i32, i32) {
    %c0_i32 = arith.constant 0 : i32
    %c0_i32_0 = arith.constant 0 : i32
    return %arg0, %c0_i32 : i32, i32
  }
}

</mosaic_0001>

<bundles_post_ra>
// kernel: _single.1
= control target key start
LH: loop header
LB: loop body
LE: loop exit
PB: predicated region body
PF: predicated region fallthrough
CT: control target
= control target key end

     0   :  { %10 = vsyncpa [#allocation3], 0  ;;  %s361_s18 = smov [#allocation2]   ;;  %s430_s0 = inlined_call_operand.vmem [shape: f32[8,16], index: 0, kind: input, shape index: {}]   ;;  %s431_s1 = inlined_call_operand.vmem [shape: f32[16,128], index: 1, kind: input, shape index: {}]   ;;  %s432_s2 = inlined_call_operand.vmem [shape: f32[1,128], index: 2, kind: input, shape index: {}]   ;;  %s433_s3 = inlined_call_operand.hbm [shape: f32[128,128], index: 3, kind: input, shape index: {}]   ;;  %s434_s4 = inlined_call_operand.vmem [shape: f32[1,128], index: 4, kind: input, shape index: {}]   ;;  %s435_s5 = inlined_call_operand.vmem [shape: f32[8,128], index: 5, kind: output, shape index: {}]  }
   0x1   :  { %s22_s19 = sshll.u32 %s361_s18, 4  ;;  %s337_s22 = scalar_lea.hbm %s433_s3, 2048  ;;  %s23_s19 = int_to_ptr.vmem [resolvable:$true] %s22_s19 }
   0x2   :  { %p338_p0 = scmp.ne.s32.totalorder %s433_s3, %s337_s22  ;;  %p341_p1 = scmp.lt.u32.totalorder %s337_s22, %s433_s3 }
   0x4   :  { %p343_p2 = pnand %p341_p1, %p338_p0 }
   0x6   :  { %346 = shalt.err (!%p343_p2)
}
   0x7   :  { %s347_s27 = scalar_lea.vmem %s23_s19, 2048  ;;  %p352_p4 = scmp.lt.s32.totalorder %s23_s19, %s23_s19 }
   0x8   :  { %p348_p3 = scmp.ne.s32.totalorder %s23_s19, %s347_s27  ;;  %p353_p5 = scmp.lt.s32.totalorder %s347_s27, %s347_s27 }
   0xa   :  { %p354_p6 = por %p353_p5, %p352_p4 }
   0xc   :  { %p355_p7 = pnand %p354_p6, %p348_p3 }
   0xe   :  { %358 = shalt.err (!%p355_p7)
}
   0xf   :  { %s362_s28 = smov 128   ;;  %s363_s29 = smov 8  }
  0x10   :  { %28 = dma.hbm_to_vmem [thread:$0]  %s433_s3, 2048, %s23_s19, [#allocation3], %s362_s28, %s362_s28, %s363_s29  }
  0x11   :  { %359 = dma.done.wait [#allocation3], 2048  }
  0x12   :  { %360 = vsyncadd [#allocation3], 4294965248  ;;  %v364_v0 = vmov 0.0|0.0   ;;  %vm365_vm0 = vmmov 0   ;;  %v366_v1 = vmov 0.0   ;;  %v35_v2 = vld [vmem:[%s431_s1] sm:$0xff]  ;;  %v214_v36 = vlaneseq }
  0x13   :  { %300 = vmatprep.subr.bf16.mxu0 %v364_v0  ;;  %262 = vmatprep.mubr.msk.f32.mxu0 %vm365_vm0, %v366_v1  ;;  %v36_v3 = vld [vmem:[%s431_s1 + $0x8] sm:$0xff]  ;;  %v121_v5 = vld [vmem:[#allocation2] sm:$0xff]  ;;  %v123_v7 = vld [vmem:[#allocation2 + $0x10] sm:$0xff]  ;;  %vm44_vm1 = vcmask 130048  }
  0x14   :  { %303 = vmatprep.subr.bf16.mxu1 %v364_v0  ;;  %297 = vmatprep.mubr.msk.f32.mxu1 %vm365_vm0, %v366_v1  ;;  %v301_v4 = vpack.c.bf16 %v36_v3, %v35_v2  ;;  %v122_v6 = vld [vmem:[#allocation2 + $0x8] sm:$0xff]  ;;  %v124_v9 = vld [vmem:[#allocation2 + $0x18] sm:$0xff]  ;;  %v34_v10 = vld [vmem:[%s430_s0] sm:$0xff]  ;;  %v215_v37 = vand.u32 127, %v214_v36 }
  0x15   :  { %v304_v8 = vpack.c.bf16 %v122_v6, %v121_v5  ;;  %v307_v11 = vpack.c.bf16 %v124_v9, %v123_v7  ;;  %v125_v12 = vld [vmem:[#allocation2 + $0x20] sm:$0xff]  ;;  %v126_v13 = vld [vmem:[#allocation2 + $0x28] sm:$0xff]  ;;  %v127_v15 = vld [vmem:[#allocation2 + $0x30] sm:$0xff] }
  0x16   :  { %302 = vmatpush3.bf16.msra.mxu0 %v301_v4  ;;  %v310_v14 = vpack.c.bf16 %v126_v13, %v125_v12  ;;  %v128_v16 = vld [vmem:[#allocation2 + $0x38] sm:$0xff]  ;;  %v129_v18 = vld [vmem:[#allocation2 + $0x40] sm:$0xff]  ;;  %v130_v19 = vld [vmem:[#allocation2 + $0x48] sm:$0xff]  ;;  %vm216_vm3 = vcmp.lt.s32.totalorder %v215_v37, 8 }
  0x17   :  { %305 = vmatpush3.bf16.msra.mxu1 %v304_v8  ;;  %v313_v17 = vpack.c.bf16 %v128_v16, %v127_v15  ;;  %v316_v20 = vpack.c.bf16 %v130_v19, %v129_v18  ;;  %v131_v21 = vld [vmem:[#allocation2 + $0x50] sm:$0xff]  ;;  %v132_v22 = vld [vmem:[#allocation2 + $0x58] sm:$0xff]  ;;  %v133_v24 = vld [vmem:[#allocation2 + $0x60] sm:$0xff] }
  0x18   :  { %306 = vmatprep.subr.bf16.mxu1 %v364_v0  ;;  %v319_v23 = vpack.c.bf16 %v132_v22, %v131_v21  ;;  %v134_v25 = vld [vmem:[#allocation2 + $0x68] sm:$0xff]  ;;  %v135_v27 = vld [vmem:[#allocation2 + $0x70] sm:$0xff]  ;;  %v136_v28 = vld [vmem:[#allocation2 + $0x78] sm:$0xff] }
  0x19   :  { %263 = vmatmul.mubr.msk.f32.vlgmr.msra.gmra.mrb[0].mxu0 %vm44_vm1, %v34_v10  ;;  %v322_v26 = vpack.c.bf16 %v134_v25, %v133_v24  ;;  %v325_v29 = vpack.c.bf16 %v136_v28, %v135_v27  ;;  %v235_v30 = vld [vmem:[%s432_s2] ss:$0 sm:$0xff] }
  0x1a   :  { %v237_v38 = vld [vmem:[%s434_s4] ss:$0 sm:$0xff] }
  0x1b   :  { %308 = vmatpush3.bf16.msra.mxu1 %v307_v11 }
  0x1c   :  { %309 = vmatprep.subr.bf16.mxu1 %v364_v0 }
  0x1f   :  { %311 = vmatpush3.bf16.msra.mxu1 %v310_v14 }
  0x20   :  { %312 = vmatprep.subr.bf16.mxu1 %v364_v0 }
  0x23   :  { %314 = vmatpush3.bf16.msra.mxu1 %v313_v17 }
  0x24   :  { %315 = vmatprep.subr.bf16.mxu1 %v364_v0 }
  0x27   :  { %317 = vmatpush3.bf16.msra.mxu1 %v316_v20 }
  0x28   :  { %318 = vmatprep.subr.bf16.mxu1 %v364_v0 }
  0x2b   :  { %320 = vmatpush3.bf16.msra.mxu1 %v319_v23 }
  0x2c   :  { %321 = vmatprep.subr.bf16.mxu1 %v364_v0 }
  0x2f   :  { %323 = vmatpush3.bf16.msra.mxu1 %v322_v26 }
  0x30   :  { %324 = vmatprep.subr.bf16.mxu1 %v364_v0 }
  0x33   :  { %326 = vmatpush3.bf16.msra.mxu1 %v325_v29 }
  0xec   :  { %v114_v31 = vpop.f32.mrb[0].mxu0 }
  0xed   :  { %v115_v32 = vadd.f32 %v235_v30, %v114_v31  ;;  %v264_v33 = vpop.f32.mrb[1].mxu0 }
  0xef   :  { %v119_v34 = vmul.f32 0.01, %v115_v32  ;;  %vm118_vm2 = vcmp.ge.f32.partialorder %v115_v32, 0.0 }
  0xf1   :  { %v120_v35 = vsel %vm118_vm2, %v115_v32, %v119_v34 }
  0xf2   :  { %298 = vmatmul.mubr.f32.vlgmr.msra.gmra.mrb[0].mxu1 %v120_v35 }
 0x1c5   :  { %v210_v39 = vpop.f32.mrb[0].mxu1 }
 0x1c6   :  { %v211_v40 = vadd.f32 %v237_v38, %v210_v39  ;;  %v299_v41 = vpop.f32.mrb[1].mxu1 }
 0x1c8   :  { %v217_v42 = vsel %vm216_vm3, %v211_v40, -1e+30 }
 0x1c9   :  { %218 = vmax.xlane.f32.xlu0 %v217_v42 }
 0x256   :  { %v219_v43 = vpop.xlane.xlu0 %218 }
 0x257   :  { %v220_v44 = vsub.f32 %v211_v40, %v219_v43 }
 0x259   :  { %v221_v45 = vmul.f32 1.442695, %v220_v44 }
 0x25b   :  { %333 = vpow2.f32 %v221_v45 }
 0x265   :  { %v334_v46 = vpop.eup %333 }
 0x266   :  { %v223_v47 = vsel %vm216_vm3, %v334_v46, 0.0 }
 0x267   :  { %224 = vadd.xlane.f32.xlu0 %v223_v47 }
 0x2f4   :  { %v225_v48 = vpop.xlane.xlu0 %224 }
 0x2f5   :  { %335 = vrcp.f32 %v225_v48 }
 0x2ff   :  { %v336_v49 = vpop.eup %335 }
 0x300   :  { %v227_v50 = vmul.f32 %v336_v49, %v223_v47 }
 0x302   :  { %v228_v51 = vsel %vm216_vm3, %v227_v50, %v211_v40 }
 0x303   :  { %229 = vst [vmem:[%s435_s5] sm:$0xff] %v228_v51 }
 0x304   :  { %234 = vsyncpa [#allocation3], 1 }

</bundles_post_ra>
